<compile_context>
chip_gen: v5e
topology: v5e:2x2
jax: 0.10.0
libtpu: 0.0.40
codegen_flags: <defaults>
</compile_context>

<pallas_src>
import jax
import jax.numpy as jnp
from jax.experimental import pallas as pl
from jax.experimental.pallas import tpu as pltpu


def _round_up(n, m):
    return ((n + m - 1) // m) * m


def _mlp_kernel(x_ref, w1_ref, b1_ref, w2_ref, b2_ref, w3_ref, b3_ref, o_ref):
    # x_ref: (13, TILE_B) — batch on lanes.
    x = x_ref[...]
    # hidden1 + ReLU : (10, 13) @ (13, TB) -> (10, TB)
    h1 = jnp.dot(w1_ref[...], x, preferred_element_type=jnp.float32)
    h1 = jnp.maximum(h1 + b1_ref[...], 0.0)
    # hidden2 + ReLU : (10, 10) @ (10, TB) -> (10, TB)
    h2 = jnp.dot(w2_ref[...], h1, preferred_element_type=jnp.float32)
    h2 = jnp.maximum(h2 + b2_ref[...], 0.0)
    # regression head : (1, 10) @ (10, TB) -> (1, TB), lane-dense store
    out = jnp.dot(w3_ref[...], h2, preferred_element_type=jnp.float32)
    o_ref[...] = (out + b3_ref[...]).astype(o_ref.dtype)


def mlp_forward(x, params, *, tile_b=1024):
    """x: (B, 13) float32 -> (B, 1) float32.

    params are stored lane-dense / pre-transposed:
      w1: (10, 13), b1: (10, 1), w2: (10, 10), b2: (10, 1),
      w3: (1, 10),  b3: (1, 1)
    """
    w1, b1, w2, b2, w3, b3 = params
    B, F = x.shape
    assert F == w1.shape[1], (F, w1.shape)

    # Batch-on-lanes: present x as (13, B).
    xt = jnp.transpose(x)  # layout plumbing only

    # Tile must be a multiple of 128 lanes; don't over-pad tiny batches.
    tile = max(128, min(_round_up(tile_b, 128), _round_up(B, 128)))
    padded_b = _round_up(B, tile)
    if padded_b != B:
        xt = jnp.pad(xt, ((0, 0), (0, padded_b - B)))

    grid = (padded_b // tile,)

    # x / output stream over the batch grid; weights & biases use constant
    # index_maps so they are loaded once and stay VMEM-resident.
    x_spec = pl.BlockSpec((F, tile), lambda i: (0, i))
    out_spec = pl.BlockSpec((1, tile), lambda i: (0, i))

    def const_spec(arr):
        return pl.BlockSpec(arr.shape, lambda i: (0, 0))

    out_t = pl.pallas_call(
        _mlp_kernel,
        out_shape=jax.ShapeDtypeStruct((1, padded_b), jnp.float32),
        grid=grid,
        in_specs=[
            x_spec,
            const_spec(w1), const_spec(b1),
            const_spec(w2), const_spec(b2),
            const_spec(w3), const_spec(b3),
        ],
        out_specs=out_spec,
        compiler_params=pltpu.CompilerParams(
            dimension_semantics=("parallel",),
        ),
    )(xt, w1, b1, w2, b2, w3, b3)

    # (1, padded_B) -> (B, 1)
    return jnp.transpose(out_t[:, :B])


def init_params(key):
    """Deterministic params matching nn.Linear shapes, stored (out, in) / (out, 1)."""
    ks = jax.random.split(key, 6)

    def linear(kw, kb, fan_in, fan_out):
        # PyTorch default init: U(-1/sqrt(fan_in), 1/sqrt(fan_in))
        bound = 1.0 / jnp.sqrt(jnp.float32(fan_in))
        w = jax.random.uniform(kw, (fan_out, fan_in), jnp.float32, -bound, bound)
        b = jax.random.uniform(kb, (fan_out, 1), jnp.float32, -bound, bound)
        return w, b

    w1, b1 = linear(ks[0], ks[1], 13, 10)
    w2, b2 = linear(ks[2], ks[3], 10, 10)
    w3, b3 = linear(ks[4], ks[5], 10, 1)
    return (w1, b1, w2, b2, w3, b3)


def reference_forward(x, params):
    w1, b1, w2, b2, w3, b3 = params
    h = jnp.maximum(x @ w1.T + b1.T, 0.0)
    h = jnp.maximum(h @ w2.T + b2.T, 0.0)
    return h @ w3.T + b3.T


if __name__ == "__main__":
    key = jax.random.PRNGKey(0)
    k_x, k_p = jax.random.split(key)

    # Small, non-multiple-of-tile batch to exercise the grid + tail padding.
    B = 200
    x = jax.random.normal(k_x, (B, 13), dtype=jnp.float32)
    params = init_params(k_p)

    out = mlp_forward(x, params, tile_b=128)  # grid of 2 steps at this size
    out = jax.block_until_ready(out)

    ref = reference_forward(x, params)
    assert out.shape == (B, 1), out.shape
    assert jnp.allclose(out, ref, atol=1e-5, rtol=1e-5), "mismatch vs reference"

    print("KERNEL_OK")
</pallas_src>

<mosaic_0001>
module attributes {stable_mosaic.version = 11 : i64} {
  func.func @_mlp_kernel(%arg0: i32, %arg1: memref<13x128xf32, #tpu.memory_space<vmem>>, %arg2: memref<10x13xf32, #tpu.memory_space<vmem>>, %arg3: memref<10x1xf32, #tpu.memory_space<vmem>>, %arg4: memref<10x10xf32, #tpu.memory_space<vmem>>, %arg5: memref<10x1xf32, #tpu.memory_space<vmem>>, %arg6: memref<1x10xf32, #tpu.memory_space<vmem>>, %arg7: memref<1x1xf32, #tpu.memory_space<vmem>>, %arg8: memref<1x128xf32, #tpu.memory_space<vmem>>) attributes {dimension_semantics = [#tpu.dimension_semantics<parallel>], iteration_bounds = array<i64: 2>, scalar_prefetch = 0 : i64, scratch_operands = 0 : i64, tpu.core_type = #tpu.core_type<tc>, window_params = [{transform_indices = @transform_0, window_bounds = array<i64: 13, 128>}, {pipeline_mode = #tpu.pipeline_mode<synchronous>, transform_indices = @transform_1, window_bounds = array<i64: 10, 13>}, {pipeline_mode = #tpu.pipeline_mode<synchronous>, transform_indices = @transform_2, window_bounds = array<i64: 10, 1>}, {pipeline_mode = #tpu.pipeline_mode<synchronous>, transform_indices = @transform_3, window_bounds = array<i64: 10, 10>}, {pipeline_mode = #tpu.pipeline_mode<synchronous>, transform_indices = @transform_4, window_bounds = array<i64: 10, 1>}, {pipeline_mode = #tpu.pipeline_mode<synchronous>, transform_indices = @transform_5, window_bounds = array<i64: 1, 10>}, {pipeline_mode = #tpu.pipeline_mode<synchronous>, transform_indices = @transform_6, window_bounds = array<i64: 1, 1>}, {transform_indices = @transform_7, window_bounds = array<i64: 1, 128>}]} {
    %c0 = arith.constant 0 : index
    %c0_0 = arith.constant 0 : index
    %0 = vector.load %arg1[%c0, %c0_0] : memref<13x128xf32, #tpu.memory_space<vmem>>, vector<13x128xf32>
    %c0_1 = arith.constant 0 : index
    %c0_2 = arith.constant 0 : index
    %1 = vector.load %arg2[%c0_1, %c0_2] : memref<10x13xf32, #tpu.memory_space<vmem>>, vector<10x13xf32>
    %cst = arith.constant dense<0.000000e+00> : vector<10x128xf32>
    %2 = tpu.matmul %1, %0, %cst {dimension_numbers = #tpu.dot_dimension_numbers<[1], [0], [0], [1], [0, 0, 1, 1], [], []>} : vector<10x13xf32>, vector<13x128xf32>, vector<10x128xf32> -> vector<10x128xf32>
    %c0_3 = arith.constant 0 : index
    %c0_4 = arith.constant 0 : index
    %3 = vector.load %arg3[%c0_3, %c0_4] : memref<10x1xf32, #tpu.memory_space<vmem>>, vector<10x1xf32>
    %4 = vector.broadcast %3 : vector<10x1xf32> to vector<10x128xf32>
    %5 = arith.addf %2, %4 : vector<10x128xf32>
    %cst_5 = arith.constant 0.000000e+00 : f32
    %6 = vector.broadcast %cst_5 : f32 to vector<10x128xf32>
    %7 = arith.maximumf %5, %6 : vector<10x128xf32>
    %c0_6 = arith.constant 0 : index
    %c0_7 = arith.constant 0 : index
    %8 = vector.load %arg4[%c0_6, %c0_7] : memref<10x10xf32, #tpu.memory_space<vmem>>, vector<10x10xf32>
    %cst_8 = arith.constant dense<0.000000e+00> : vector<10x128xf32>
    %9 = tpu.matmul %8, %7, %cst_8 {dimension_numbers = #tpu.dot_dimension_numbers<[1], [0], [0], [1], [0, 0, 1, 1], [], []>} : vector<10x10xf32>, vector<10x128xf32>, vector<10x128xf32> -> vector<10x128xf32>
    %c0_9 = arith.constant 0 : index
    %c0_10 = arith.constant 0 : index
    %10 = vector.load %arg5[%c0_9, %c0_10] : memref<10x1xf32, #tpu.memory_space<vmem>>, vector<10x1xf32>
    %11 = vector.broadcast %10 : vector<10x1xf32> to vector<10x128xf32>
    %12 = arith.addf %9, %11 : vector<10x128xf32>
    %cst_11 = arith.constant 0.000000e+00 : f32
    %13 = vector.broadcast %cst_11 : f32 to vector<10x128xf32>
    %14 = arith.maximumf %12, %13 : vector<10x128xf32>
    %c0_12 = arith.constant 0 : index
    %c0_13 = arith.constant 0 : index
    %15 = vector.load %arg6[%c0_12, %c0_13] : memref<1x10xf32, #tpu.memory_space<vmem>>, vector<1x10xf32>
    %cst_14 = arith.constant dense<0.000000e+00> : vector<1x128xf32>
    %16 = tpu.matmul %15, %14, %cst_14 {dimension_numbers = #tpu.dot_dimension_numbers<[1], [0], [0], [1], [0, 0, 1, 1], [], []>} : vector<1x10xf32>, vector<10x128xf32>, vector<1x128xf32> -> vector<1x128xf32>
    %c0_15 = arith.constant 0 : index
    %c0_16 = arith.constant 0 : index
    %17 = vector.load %arg7[%c0_15, %c0_16] : memref<1x1xf32, #tpu.memory_space<vmem>>, vector<1x1xf32>
    %18 = vector.broadcast %17 : vector<1x1xf32> to vector<1x128xf32>
    %19 = arith.addf %16, %18 : vector<1x128xf32>
    %c0_17 = arith.constant 0 : index
    %c0_18 = arith.constant 0 : index
    %20 = vector.load %arg8[%c0_17, %c0_18] : memref<1x128xf32, #tpu.memory_space<vmem>>, vector<1x128xf32>
    tpu.vector_store %arg8[%c0_17, %c0_18], %19 {strides = array<i32>} : memref<1x128xf32, #tpu.memory_space<vmem>>, vector<1x128xf32>,
    return
  }
  func.func @transform_0(%arg0: i32) -> (i32, i32) {
    %c0_i32 = arith.constant 0 : i32
    %c0_i32_0 = arith.constant 0 : i32
    return %c0_i32, %arg0 : i32, i32
  }
  func.func @transform_1(%arg0: i32) -> (i32, i32) {
    %c0_i32 = arith.constant 0 : i32
    %c0_i32_0 = arith.constant 0 : i32
    %c0_i32_1 = arith.constant 0 : i32
    return %c0_i32, %c0_i32_0 : i32, i32
  }
  func.func @transform_2(%arg0: i32) -> (i32, i32) {
    %c0_i32 = arith.constant 0 : i32
    %c0_i32_0 = arith.constant 0 : i32
    %c0_i32_1 = arith.constant 0 : i32
    return %c0_i32, %c0_i32_0 : i32, i32
  }
  func.func @transform_3(%arg0: i32) -> (i32, i32) {
    %c0_i32 = arith.constant 0 : i32
    %c0_i32_0 = arith.constant 0 : i32
    %c0_i32_1 = arith.constant 0 : i32
    return %c0_i32, %c0_i32_0 : i32, i32
  }
  func.func @transform_4(%arg0: i32) -> (i32, i32) {
    %c0_i32 = arith.constant 0 : i32
    %c0_i32_0 = arith.constant 0 : i32
    %c0_i32_1 = arith.constant 0 : i32
    return %c0_i32, %c0_i32_0 : i32, i32
  }
  func.func @transform_5(%arg0: i32) -> (i32, i32) {
    %c0_i32 = arith.constant 0 : i32
    %c0_i32_0 = arith.constant 0 : i32
    %c0_i32_1 = arith.constant 0 : i32
    return %c0_i32, %c0_i32_0 : i32, i32
  }
  func.func @transform_6(%arg0: i32) -> (i32, i32) {
    %c0_i32 = arith.constant 0 : i32
    %c0_i32_0 = arith.constant 0 : i32
    %c0_i32_1 = arith.constant 0 : i32
    return %c0_i32, %c0_i32_0 : i32, i32
  }
  func.func @transform_7(%arg0: i32) -> (i32, i32) {
    %c0_i32 = arith.constant 0 : i32
    %c0_i32_0 = arith.constant 0 : i32
    return %c0_i32, %arg0 : i32, i32
  }
}

</mosaic_0001>

<bundles_post_ra>
// kernel: tpu_custom_call.1
= control target key start
LH: loop header
LB: loop body
LE: loop exit
PB: predicated region body
PF: predicated region fallthrough
CT: control target
= control target key end

     0   :  { %s999_s0 = inlined_call_operand.vmem [shape: f32[13,256], index: 0, kind: input, shape index: {}]   ;;  %s1000_s1 = inlined_call_operand.hbm [shape: f32[10,13], index: 1, kind: input, shape index: {}]   ;;  %s1001_s2 = inlined_call_operand.vmem [shape: f32[10,1], index: 2, kind: input, shape index: {}]   ;;  %s1002_s3 = inlined_call_operand.hbm [shape: f32[10,10], index: 3, kind: input, shape index: {}]   ;;  %s1003_s4 = inlined_call_operand.vmem [shape: f32[10,1], index: 4, kind: input, shape index: {}]   ;;  %s1004_s5 = inlined_call_operand.vmem [shape: f32[1,10], index: 5, kind: input, shape index: {}]   ;;  %s1005_s6 = inlined_call_operand.<no memory space> [shape: f32[1,1], index: 6, kind: input, shape index: {}]   ;;  %s1006_s7 = inlined_call_operand.hbm [shape: f32[1,256], index: 7, kind: output, shape index: {}]  }
   0x1   :  { %v12_v0 = vstv %s1005_s6 }
   0x2   :  { %13 = vst [vmem:[#allocation2] sm:$0x1] %v12_v0 }
   0x3   :  { %14 = vsyncpa [#allocation5], 0 }
   0x4   :  { %15 = vsyncpa [#allocation8], 0 }
   0x5   :  { %16 = vsyncpa [#allocation6], 0 }
   0x6   :  { %18 = vsyncpa [#allocation6 + $0x1], 0  ;;  %s853_s26 = smov 0   ;;  %s855_s27 = smov 0  }
   0x7   :  { %s857_s28 = smov 0   ;;  %s859_s29 = smov 0  }
   0x8 LB: > { %s874_s6 = sadd.s32 4294967295, %s803_s29   ;;  %s584_s30 = sadd.s32 4294967294, %s803_s29   ;;  %s803_s29 = sphi %s859_s29, %s1014_s29   ;;  %s799_s28 = sphi %s857_s28, %s1013_s28   ;;  %s795_s27 = sphi %s855_s27, %s1012_s27   ;;  %s791_s26 = sphi %s853_s26, %s1011_s26  }
   0x9   : > { %s878_s8 = sadd.s32 1, %s803_s29   ;;  %s31_s9 = sadd.s32 1, %s799_s28 }
   0xa   : > { %s28_s10 = ssub.s32 %s803_s29, %s878_s8  ;;  %p38_p0 = scmp.ne.s32.totalorder %s799_s28, %s795_s27 }
   0xb   : > { %p29_p1 = scmp.eq.s32.totalorder %s28_s10, 0  ;;  %p39_p2 = scmp.eq.s32.totalorder %s803_s29, 0 }
   0xc   : > { %p194_p3 = scmp.eq.s32.totalorder %s874_s6, 1  ;;  %p199_p4 = scmp.ne.s32.totalorder %s795_s27, %s791_s26 }
   0xd   : > { %s890_s11 = scalar_select %p29_p1, %s799_s28, %s31_s9  }
   0xe   : > { %p892_p5 = por %p39_p2, %p38_p0  ;;  %p896_p6 = por %p194_p3, %p38_p0 }
   0xf   : > { %p200_p7 = scmp.eq.s32.totalorder %s584_s30, 1  ;;  %p585_p8 = scmp.ge.s32.totalorder %s803_s29, 1 }
  0x10   : > { %p207_p9 = scmp.lt.s32.totalorder %s803_s29, 3  ;;  %p628_p11 = scmp.eq.s32.totalorder %s874_s6, 0 }
  0x11   : > { %p902_p10 = por %p200_p7, %p199_p4  ;;  %s218_s18 = sshll.u32 %s1000_s1, 4  ;;  %s219_s18 = int_to_ptr.hbm [resolvable:$true] %s218_s18 }
  0x12   : > { %p907_p12 = pnand %p585_p8, %p207_p9  ;;  %s805_s19 = smov [#allocation4]  }
  0x13   : > { %s220_s20 = sshll.u32 %s805_s19, 4  ;;  %s235_s23 = sshll.u32 %s1002_s3, 4  ;;  %s221_s20 = int_to_ptr.vmem [resolvable:$true] %s220_s20  ;;  %s236_s23 = int_to_ptr.hbm [resolvable:$true] %s235_s23 }
  0x14   : > { %p617_p13 = pneg %p907_p12  ;;  %s806_s24 = smov 128  }
  0x15   : > { %s807_s25 = smov 8   ;;  %s808_s30 = smov [#allocation7]  }
  0x16   : > { %p618_p0 = pnand %p628_p11, %p617_p13  ;;  %s237_s9 = sshll.u32 %s808_s30, 4  ;;  %s238_s9 = int_to_ptr.vmem [resolvable:$true] %s237_s9 }
  0x17   : > { %p588_p1 = scmp.ge.s32.totalorder %s803_s29, 2 }
  0x18   : > { %620 = dma.hbm_to_vmem [thread:$0]  (!%p618_p0), %s219_s18, 256, %s221_s20, [#allocation5], %s806_s24, %s806_s24, %s807_s25  }
  0x19   : > { %623 = dma.hbm_to_vmem [thread:$0]  (!%p618_p0), %s236_s23, 256, %s238_s9, [#allocation8], %s806_s24, %s806_s24, %s807_s25  }
  0x1a   : > { %256 = sbr.rel (%p588_p1) target bundleno = 37 (0x25), region = 40 }
  0x1f   : > { %259 = sbr.rel (!%p892_p5) target bundleno = 37 (0x25), region = 44  ;;  %s261_s10 = sand.u32 (%p892_p5), 1, %s799_s28  }
  0x20   : > { %s590_s16 = sshll.u32 (%p892_p5), %s803_s29, 3  ;;  %s589_s17 = sshll.u32 (%p892_p5), %s261_s10, 4 }
  0x21   : > { %s265_s18 = scalar_lea.vmem (%p892_p5), %s999_s0, %s590_s16  ;;  %s263_s20 = scalar_lea.vmem (%p892_p5), [#allocation3], %s589_s17 }
  0x22   : > { %v296_v1 = vld [vmem:[%s265_s18] sm:$0xff] (%p892_p5)  ;;  %v298_v2 = vld [vmem:[%s265_s18 + $0x10] sm:$0xff] (%p892_p5) }
  0x23   : > { %297 = vst [vmem:[%s263_s20] sm:$0xff] (%p892_p5), %v296_v1 }
  0x24   : > { %299 = vst [vmem:[%s263_s20 + $0x8] sm:$0xff] %v298_v2 }
  0x25 PF: > { %308 = sbr.rel (%p907_p12) target bundleno = 468 (0x1d4), region = 82  ;;  %s934_s12 = sand.u32 (!%p907_p12), 1, %s795_s27  }
  0x26   : > { %s592_s22 = sshll.u32 (!%p907_p12), %s934_s12, 4 }
  0x27   : > { %s313_s23 = scalar_lea.vmem (!%p907_p12), [#allocation3], %s592_s22 }
  0x2a   : > { %778 = dma.done.wait (%p628_p11), [#allocation5], 256  }
  0x2b   : > { %780 = vsyncadd (%p628_p11), [#allocation5], 4294967040 }
  0x2c   : > { %782 = dma.done.wait (%p628_p11), [#allocation8], 256  }
  0x2d   : > { %784 = vsyncadd (%p628_p11), [#allocation8], 4294967040  ;;  %v809_v3 = vmov 0   ;;  %vm374_vm0 = vcmask 1044480   ;;  %v352_v4 = vld [vmem:[%s313_s23 + $0x8] sm:$0x1f]  ;;  %s497_s22 = scalar_lea.hbm %s1006_s7, %s874_s6 }
  0x2e   : > { %670 = vset.pattern.permute.xlu0 %v809_v3  ;;  %671 = vset.pattern.permute.xlu1 %v809_v3  ;;  %v351_v5 = vld [vmem:[%s313_s23] sm:$0xff]  ;;  %vm367_vm1 = vcmask 105472   ;;  %v354_v7 = vld [vmem:[#allocation4 + $0x8] sm:$0x3]  ;;  %vm424_vm2 = vcmask 1041408   ;;  %vm417_vm3 = vcmask 80896  }
  0x2f   : > { %672 = vset.pattern.permute.xlu2 %v809_v3  ;;  %595 = vmatpush.msk.msra.mxu0 %vm374_vm0, %v352_v4  ;;  %v353_v6 = vld [vmem:[#allocation4] sm:$0xff]  ;;  %v403_v20 = vld [vmem:[#allocation7] sm:$0xff]  ;;  %v404_v21 = vld [vmem:[#allocation7 + $0x8] sm:$0x3]  ;;  %s350_s23 = scalar_lea.vmem [#allocation9], %s934_s12  ;;  %s501_s24 = sshll.u32 %s497_s22, 4  ;;  %s502_s24 = int_to_ptr.hbm [resolvable:$true] %s501_s24 }
  0x30   : > { %605 = vmatpush.msk.msra.mxu3 %vm374_vm0, %v352_v4  ;;  %v356_v8 = vld [vmem:[%s1001_s2 + $0x8] sm:$0x3]  ;;  %v355_v9 = vld [vmem:[%s1001_s2] sm:$0xff]  ;;  %s499_s15 = sshll.u32 %s350_s23, 4  ;;  %s489_s25 = scalar_lea.sflag [#allocation6], %s934_s12  ;;  %s500_s15 = int_to_ptr.vmem [resolvable:$true] %s499_s15 }
  0x31   : > { %364 = vperm.xlu0 %670, %v356_v8   ;;  %393 = vmatpush.msra.mxu0 %v351_v5  ;;  %v406_v10 = vld [vmem:[%s1003_s4 + $0x8] sm:$0x3]  ;;  %v405_v11 = vld [vmem:[%s1003_s4] sm:$0xff]  ;;  %s747_s30 = sshra.s32 %s502_s24, 4  ;;  %s753_s6 = scalar_lea.hbm %s1006_s7, 2  ;;  %s748_s30 = int_to_ptr.hbm [resolvable:$true] %s747_s30 }
  0x32   : > { %606 = vmatpush.msra.mxu3 %v351_v5  ;;  %596 = vmatmul.msk.f32.vlgmr.msra.gmra.mxu0 %vm367_vm1, %v353_v6  ;;  %v454_v22 = vld [vmem:[#allocation2] sm:$0x1]  ;;  %s749_s9 = scalar_lea.hbm %s748_s30, 1  ;;  %p754_p5 = scmp.lt.s32.totalorder %s748_s30, %s1006_s7 }
  0x33   : > { %597 = vmatmul.msk.f32.vlgmr.msra.gmra.mxu3 %vm367_vm1, %v354_v7  ;;  %414 = vperm.xlu1 %671, %v406_v10   ;;  %v453_v31 = vld [vmem:[%s1004_s5] sm:$0x1]  ;;  %p750_p2 = scmp.ne.s32.totalorder %s748_s30, %s749_s9  ;;  %p755_p7 = scmp.lt.s32.totalorder %s753_s6, %s749_s9 }
  0x34   : > { %457 = vperm.xlu2 %672, %v454_v22  }
  0x35   : > { %p751_p3 = pnand %p750_p2, %p896_p6  ;;  %p756_p8 = por %p755_p7, %p754_p5 }
  0x37   : > { %p752_p4 = pneg %p751_p3 }
  0x39   : > { %359 = vperm.xlu0 %670, %v355_v9   ;;  %p757_p9 = pnand %p756_p8, %p752_p4 }
  0x3b   : > { %409 = vperm.xlu1 %671, %v405_v11  }
  0x8e   : > { %v458_v32 = vpop.permute.xlu2 %457 }
  0x8f   : > { %v460_v33 = vperm.slane %v458_v32, 0 }
  0xa3   : > { %v365_v12 = vpop.permute.xlu0 %364 }
  0xa5   : > { %v415_v23 = vpop.permute.xlu1 %414 }
  0xab   : > { %v360_v13 = vpop.permute.xlu0 %359 }
  0xad   : > { %v410_v25 = vpop.permute.xlu1 %409 }
  0xaf   : > { %v395_v14 = vpop.f32.mrf.mxu0 }
  0xb0   : > { %v396_v16 = vadd.f32 %v395_v14, %v360_v13 }
  0xb2   : > { %v401_v19 = vmax.f32 %v396_v16, 0.0 }
  0xb6   : > { %v398_v15 = vpop.f32.mrf.mxu3 }
  0xb7   : > { %v399_v17 = vadd.f32 %v398_v15, %v365_v12 }
  0xb9   : > { %v402_v18 = vmax.f32 %v399_v17, 0.0 }
  0xbb   : > { %598 = vmatpush.msk.msra.mxu1 %vm424_vm2, %v402_v18 }
  0xbd   : > { %443 = vmatpush.msra.mxu1 %v401_v19 }
  0xbe   : > { %599 = vmatmul.msk.f32.vlgmr.msra.gmra.mxu1 %vm417_vm3, %v403_v20 }
  0xc6   : > { %600 = vmatmul.msk.f32.gmra.mxu1 %vm417_vm3, %v404_v21 }
 0x13b   : > { %v445_v24 = vpop.f32.mrf.mxu1 }
 0x13c   : > { %v446_v27 = vadd.f32 %v445_v24, %v410_v25 }
 0x13e   : > { %v451_v30 = vmax.f32 %v446_v27, 0.0 }
 0x143   : > { %v448_v26 = vpop.f32.mrf.mxu1 }
 0x144   : > { %v449_v28 = vadd.f32 %v448_v26, %v415_v23 }
 0x146   : > { %v452_v29 = vmax.f32 %v449_v28, 0.0 }
 0x148   : > { %601 = vmatpush.msk.msra.mxu2 %vm424_vm2, %v452_v29 }
 0x14a   : > { %482 = vmatpush.msra.mxu2 %v451_v30 }
 0x14b   : > { %602 = vmatmul.msk.f32.vlgmr.msra.gmra.mxu2 %vm417_vm3, %v453_v31 }
 0x1ce   : > { %v484_v34 = vpop.f32.mrf.mxu2 }
 0x1cf   : > { %v485_v35 = vadd.f32 %v484_v34, %v460_v33 }
 0x1d1   : > { %487 = vst [vmem:[%s350_s23] sm:$0x1] %v485_v35 }
 0x1d2   : > { %760 = shalt.err (!%p757_p9)
}
 0x1d3   : > { %615 = dma.vmem_to_hbm [thread:$0]  (%p896_p6), %s500_s15, 16, %s502_s24, %s489_s25  }
 0x1d4 PF: > { %s513_s12 = sand.u32 1, %s791_s26   ;;  %p625_p11 = pnand %p588_p1, %p902_p10 }
 0x1d5   : > { %s514_s21 = scalar_lea.sflag [#allocation6], %s513_s12 }
 0x1d6   : > { %p626_p12 = pneg %p625_p11 }
 0x1d8   : > { %786 = dma.done.wait (%p626_p12), %s514_s21, 16  }
 0x1d9   : > { %788 = vsyncadd (%p626_p12), %s514_s21, 4294967280  ;;  %p21_p13 = scmp.ge.s32.totalorder %s878_s8, 4   ;;  %s1011_s26 = smov %s795_s27 }
 0x1da   : > { %s1012_s27 = smov %s799_s28  ;;  %s1013_s28 = smov %s890_s11 }
 0x1db   : > { %s1014_s29 = smov %s878_s8  ;;  %23 = sbr.rel (!%p21_p13) target bundleno = 8 (0x8), region = 135 }
 0x1e0   :  { %519 = vsyncpa [#allocation5], 1 }
 0x1e1   :  { %521 = vsyncpa [#allocation5 + $0x1], 1 }
 0x1e2   :  { %522 = vsyncpa [#allocation8], 1 }
 0x1e3   :  { %523 = vsyncpa [#allocation6], 1 }
 0x1e4   :  { %525 = vsyncpa [#allocation6 + $0x1], 1 }

</bundles_post_ra>
